<compile_context>
chip_gen: v6e
topology: v6e:2x2x1
jax: 0.10.0
libtpu: 0.0.40
codegen_flags: <defaults>
</compile_context>

<pallas_src>
import math

import numpy as np
import jax
import jax.numpy as jnp
from jax.experimental import pallas as pl
from jax.experimental.pallas import tpu as pltpu


# ----------------------------------------------------------------------------
# Sizing constants.
# ----------------------------------------------------------------------------
_CHUNK_TARGET = 1024   # target max(chunk_in, chunk_out) samples per chunk
_TILE_M = 512          # (batch * chunks) rows per grid step
_LANE = 128
_SUBLANE = 8           # f32 sublane packing
_PLAN_CACHE = {}


def _cdiv(a, b):
    return -(-a // b)


def _round_up(a, b):
    return _cdiv(a, b) * b


# ----------------------------------------------------------------------------
# torchaudio-equivalent windowed-sinc polyphase kernels (host-side, tiny).
# ----------------------------------------------------------------------------
def _sinc_kernels(orig: int, new: int, lowpass_filter_width: int = 6,
                  rolloff: float = 0.99):
    """Returns (kernels (new, K), width) with K = 2*width + orig."""
    base_freq = min(orig, new) * rolloff
    width = int(math.ceil(lowpass_filter_width * orig / base_freq))
    idx = np.arange(-width, width + orig, dtype=np.float64) / orig            # (K,)
    phases = np.arange(0, -new, -1, dtype=np.float64)[:, None] / new          # (new,1)
    t = (phases + idx[None, :]) * base_freq
    t = np.clip(t, -lowpass_filter_width, lowpass_filter_width)
    window = np.cos(t * math.pi / lowpass_filter_width / 2.0) ** 2            # hann
    t = t * math.pi
    kernels = np.where(t == 0.0, 1.0, np.sin(t) / np.where(t == 0.0, 1.0, t))
    kernels = kernels * window * (base_freq / orig)                           # (new, K)
    return kernels, width


def _dense_resample_matrix(orig_freq: int, new_freq: int, in_len: int) -> np.ndarray:
    """Dense (in_len, out_len) matrix — ONLY used as a test reference at tiny T."""
    gcd = math.gcd(int(orig_freq), int(new_freq))
    orig, new = int(orig_freq) // gcd, int(new_freq) // gcd
    if orig == new:
        return np.eye(in_len, dtype=np.float32)
    kernels, width = _sinc_kernels(orig, new)
    K = kernels.shape[1]
    num_frames = in_len // orig + 1
    target_len = _cdiv(new * in_len, orig)
    M = np.zeros((in_len, target_len), dtype=np.float64)
    row_off = np.arange(K) - width
    for f in range(num_frames):
        rows = f * orig + row_off
        rmask = (rows >= 0) & (rows < in_len)
        for i in range(new):
            col = f * new + i
            if col >= target_len:
                break
            M[rows[rmask], col] += kernels[i, rmask]
    return M.astype(np.float32)


# ----------------------------------------------------------------------------
# Chunk plan: one small, chunk-invariant matrix + gather indices.
# ----------------------------------------------------------------------------
def _build_plan(orig_freq: int, new_freq: int, in_len: int):
    key = (int(orig_freq), int(new_freq), int(in_len))
    if key in _PLAN_CACHE:
        return _PLAN_CACHE[key]

    gcd = math.gcd(int(orig_freq), int(new_freq))
    orig, new = int(orig_freq) // gcd, int(new_freq) // gcd
    if orig == new:
        _PLAN_CACHE[key] = None
        return None

    kernels, width = _sinc_kernels(orig, new)
    K = kernels.shape[1]                      # 2*width + orig

    F = max(1, _CHUNK_TARGET // max(orig, new))   # frames per chunk
    c_in = F * orig                               # input samples per chunk
    c_out = F * new                               # output samples per chunk
    slab = c_in + 2 * width                       # chunk input incl. halo
    slab_pad = _round_up(max(slab, _LANE), _LANE)
    c_out_pad = _round_up(max(c_out, _LANE), _LANE)

    num_frames = in_len // orig + 1
    n_chunks = _cdiv(num_frames, F)
    target_len = _cdiv(new * in_len, orig)

    # Per-chunk matrix: identical for every chunk (block-Toeplitz structure).
    mat = np.zeros((slab_pad, c_out_pad), dtype=np.float32)
    kT = kernels.T                                # (K, new)
    for f in range(F):
        mat[f * orig:f * orig + K, f * new:(f + 1) * new] = kT

    # Padded-signal length so every chunk slab (incl. lane padding) is in bounds.
    x_pad_len = max(width + n_chunks * c_in + width,
                    (n_chunks - 1) * c_in + slab_pad)
    idx = (np.arange(n_chunks, dtype=np.int64)[:, None] * c_in
           + np.arange(slab_pad, dtype=np.int64)[None, :]).astype(np.int32)

    plan = dict(matrix=jnp.asarray(mat), idx=jnp.asarray(idx),
                width=width, c_in=c_in, c_out=c_out, c_out_pad=c_out_pad,
                slab_pad=slab_pad, n_chunks=n_chunks, x_pad_len=x_pad_len,
                in_len=in_len, target_len=target_len)
    _PLAN_CACHE[key] = plan
    return plan


# ----------------------------------------------------------------------------
# Pallas kernel: (tile_m, slab) x (slab, c_out) matmul with the small matrix
# resident in VMEM (constant block index -> DMA'd once for the whole grid).
# ----------------------------------------------------------------------------
def _resample_matmul_kernel(x_ref, m_ref, o_ref):
    o_ref[...] = jnp.dot(x_ref[...], m_ref[...],
                         preferred_element_type=jnp.float32).astype(o_ref.dtype)


def _chunked_resample(x2d: jax.Array, plan: dict) -> jax.Array:
    """x2d: (B, T) f32 -> (B, target_len) f32  (== torchaudio resample)."""
    B, T = x2d.shape
    assert T == plan["in_len"]
    slab_pad, c_out_pad = plan["slab_pad"], plan["c_out_pad"]
    n_chunks, c_out = plan["n_chunks"], plan["c_out"]

    # XLA-side glue: zero-pad signal, gather overlapping chunk slabs.
    xp = jnp.zeros((B, plan["x_pad_len"]), jnp.float32)
    xp = xp.at[:, plan["width"]:plan["width"] + T].set(x2d.astype(jnp.float32))
    slabs = jnp.take(xp, plan["idx"], axis=1)          # (B, n_chunks, slab_pad)
    slabs = slabs.reshape(B * n_chunks, slab_pad)

    m_rows = B * n_chunks
    tile_m = min(_TILE_M, _round_up(m_rows, _SUBLANE))
    m_pad = _round_up(m_rows, tile_m)
    if m_pad != m_rows:
        slabs = jnp.pad(slabs, ((0, m_pad - m_rows), (0, 0)))

    out = pl.pallas_call(
        _resample_matmul_kernel,
        out_shape=jax.ShapeDtypeStruct((m_pad, c_out_pad), jnp.float32),
        grid=(m_pad // tile_m,),
        in_specs=[
            # LHS: each (batch*chunk) row block read exactly once.
            pl.BlockSpec((tile_m, slab_pad), lambda i: (i, 0)),
            # Resampling matrix: constant block index -> resident in VMEM.
            pl.BlockSpec((slab_pad, c_out_pad), lambda i: (0, 0)),
        ],
        out_specs=pl.BlockSpec((tile_m, c_out_pad), lambda i: (i, 0)),
        compiler_params=pltpu.CompilerParams(
            dimension_semantics=("parallel",),        # megacore over row blocks
            vmem_limit_bytes=32 * 1024 * 1024,
        ),
    )(slabs, plan["matrix"])

    out = out[:m_rows, :c_out].reshape(B, n_chunks * c_out)
    return out[:, :plan["target_len"]]


# ----------------------------------------------------------------------------
# Module-equivalent wrappers.
# ----------------------------------------------------------------------------
class Resample:
    """JAX equivalent of the PyTorch Resample block."""

    def __init__(self, input_sr: int, new_sr: int, return_original_sr: bool = True):
        self.input_sr = int(input_sr)
        self.new_sr = int(new_sr)
        self.return_original_sr = return_original_sr

    def __call__(self, audio: jax.Array, labels: jax.Array):
        lead = audio.shape[:-1]
        T = audio.shape[-1]
        a2 = audio.reshape((-1, T)).astype(jnp.float32)
        B = a2.shape[0]

        plan_down = _build_plan(self.input_sr, self.new_sr, T)

        if self.return_original_sr:
            if plan_down is None:               # identity resample
                return audio, labels
            mid = _chunked_resample(a2, plan_down)                  # f32 intermediate
            plan_up = _build_plan(self.new_sr, self.input_sr, mid.shape[1])
            out = mid if plan_up is None else _chunked_resample(mid, plan_up)
            t_out = out.shape[1]
            return out.reshape(lead + (t_out,)), labels
        else:
            if plan_down is None:
                return audio, labels
            l2 = labels.reshape((-1, T)).astype(jnp.float32)
            # Stack audio + labels on the M axis: one launch, shared matrix.
            both = jnp.concatenate([a2, l2], axis=0)
            res = _chunked_resample(both, plan_down)
            t_out = res.shape[1]
            a_out = res[:B].reshape(lead + (t_out,))
            l_out = res[B:].reshape(labels.shape[:-1] + (t_out,))
            return a_out, l_out


class DynamicResampler:
    """JAX equivalent of the PyTorch DynamicResampler."""

    def __init__(self, input_sr: int, output_sr, output_sr_weights=None):
        self.input_sr = int(input_sr)
        self.output_sr = [int(s) for s in output_sr]
        if output_sr_weights:
            self.output_sr_weights = list(output_sr_weights)
        else:
            self.output_sr_weights = [1.0 / len(self.output_sr)] * len(self.output_sr)

    def _select_rate(self):
        # Host-side random choice (matches np.random.choice in the reference).
        return int(np.random.choice(a=self.output_sr, p=self.output_sr_weights))

    def __call__(self, audio: jax.Array, labels: jax.Array):
        selected_rate = self._select_rate()
        resampler = Resample(self.input_sr, selected_rate)   # return_original_sr=True
        return resampler(audio, labels)


# ----------------------------------------------------------------------------
if __name__ == "__main__":
    np.random.seed(0)  # deterministic sampling-rate selection

    input_sr = 16000
    output_sr = [8000, 4000]
    B, T = 4, 256  # small (batch, time) consistent with 1-D time-domain audio

    key = jax.random.PRNGKey(0)
    k_audio, k_labels = jax.random.split(key)
    audio = jax.random.normal(k_audio, (B, T), dtype=jnp.float32)
    labels = (jax.random.uniform(k_labels, (B, T)) > 0.5).astype(jnp.float32)

    module = DynamicResampler(input_sr, output_sr)
    out_audio, out_labels = module(audio, labels)
    jax.block_until_ready((out_audio, out_labels))

    # labels pass through unchanged on the return_original_sr=True path
    assert out_labels.shape == (B, T)
    assert bool(jnp.all(out_labels == labels))
    assert out_audio.shape[0] == B
    assert bool(jnp.all(jnp.isfinite(out_audio)))

    # Deterministic numeric check of the chunked Pallas path against a dense
    # float64-accumulated reference of the identical linear operator.
    chk_audio, _ = Resample(input_sr, 8000)(audio, labels)
    m_down = _dense_resample_matrix(input_sr, 8000, T)
    m_up = _dense_resample_matrix(8000, input_sr, m_down.shape[1])
    audio_np = np.asarray(audio, dtype=np.float64)
    ref = (audio_np @ m_down.astype(np.float64)) @ m_up.astype(np.float64)
    assert chk_audio.shape == ref.shape
    max_err = float(np.max(np.abs(np.asarray(chk_audio, dtype=np.float64) - ref)))
    assert max_err < 5e-2, f"max abs err {max_err}"

    jax.block_until_ready(chk_audio)
    print("KERNEL_OK")
</pallas_src>

<mosaic_0001>
module attributes {stable_mosaic.version = 11 : i64} {
  func.func @_resample_matmul_kernel(%arg0: i32, %arg1: memref<8x1152xf32, #tpu.memory_space<vmem>>, %arg2: memref<1152x256xf32, #tpu.memory_space<vmem>>, %arg3: memref<8x256xf32, #tpu.memory_space<vmem>>) attributes {dimension_semantics = [#tpu.dimension_semantics<parallel>], iteration_bounds = array<i64: 1>, scalar_prefetch = 0 : i64, scratch_operands = 0 : i64, tpu.core_type = #tpu.core_type<tc>, window_params = [{transform_indices = @transform_0, window_bounds = array<i64: 8, 1152>}, {pipeline_mode = #tpu.pipeline_mode<synchronous>, transform_indices = @transform_1, window_bounds = array<i64: 1152, 256>}, {transform_indices = @transform_2, window_bounds = array<i64: 8, 256>}]} {
    %c0 = arith.constant 0 : index
    %c0_0 = arith.constant 0 : index
    %0 = vector.load %arg1[%c0, %c0_0] : memref<8x1152xf32, #tpu.memory_space<vmem>>, vector<8x1152xf32>
    %c0_1 = arith.constant 0 : index
    %c0_2 = arith.constant 0 : index
    %1 = vector.load %arg2[%c0_1, %c0_2] : memref<1152x256xf32, #tpu.memory_space<vmem>>, vector<1152x256xf32>
    %cst = arith.constant dense<0.000000e+00> : vector<8x256xf32>
    %2 = tpu.matmul %0, %1, %cst {dimension_numbers = #tpu.dot_dimension_numbers<[1], [0], [0], [1], [0, 0, 1, 1], [], []>} : vector<8x1152xf32>, vector<1152x256xf32>, vector<8x256xf32> -> vector<8x256xf32>
    %c0_3 = arith.constant 0 : index
    %c0_4 = arith.constant 0 : index
    %3 = vector.load %arg3[%c0_3, %c0_4] : memref<8x256xf32, #tpu.memory_space<vmem>>, vector<8x256xf32>
    tpu.vector_store %arg3[%c0_3, %c0_4], %2 {strides = array<i32>} : memref<8x256xf32, #tpu.memory_space<vmem>>, vector<8x256xf32>,
    return
  }
  func.func @transform_0(%arg0: i32) -> (i32, i32) {
    %c0_i32 = arith.constant 0 : i32
    %c0_i32_0 = arith.constant 0 : i32
    return %arg0, %c0_i32 : i32, i32
  }
  func.func @transform_1(%arg0: i32) -> (i32, i32) {
    %c0_i32 = arith.constant 0 : i32
    %c0_i32_0 = arith.constant 0 : i32
    %c0_i32_1 = arith.constant 0 : i32
    return %c0_i32, %c0_i32_0 : i32, i32
  }
  func.func @transform_2(%arg0: i32) -> (i32, i32) {
    %c0_i32 = arith.constant 0 : i32
    %c0_i32_0 = arith.constant 0 : i32
    return %arg0, %c0_i32 : i32, i32
  }
}

</mosaic_0001>

<bundles_post_ra>
// kernel: tpu_custom_call.1
= control target key start
LH: loop header
LB: loop body
LE: loop exit
PB: predicated region body
PF: predicated region fallthrough
CT: control target
= control target key end

     0   :  { %7 = vsyncpa [#allocation3], 0  ;;  %s810_s0 = inlined_call_operand.hbm [shape: f32[8,1152], index: 0, kind: input, shape index: {}]   ;;  %s811_s1 = inlined_call_operand.hbm [shape: f32[1152,256], index: 1, kind: input, shape index: {}]   ;;  %s812_s2 = inlined_call_operand.hbm [shape: f32[8,256], index: 2, kind: output, shape index: {}]  }
   0x1   :  { %8 = vsyncpa [#allocation6], 0 }
   0x2   :  { %9 = vsyncpa [#allocation4], 0  ;;  %s780_s9 = smov [#allocation2]   ;;  %s781_s11 = smov [#allocation5]  }
   0x3   :  { %s16_s10 = sshll.u32 %s780_s9, 4  ;;  %s25_s12 = sshll.u32 %s781_s11, 4  ;;  %s17_s10 = int_to_ptr.vmem [resolvable:$true] %s16_s10  ;;  %s26_s12 = int_to_ptr.vmem [resolvable:$true] %s25_s12 }
   0x4   :  { %s722_s13 = scalar_lea.vmem %s17_s10, 1152  ;;  %p727_p1 = scmp.lt.s32.totalorder %s17_s10, %s17_s10 }
   0x5   :  { %p723_p0 = scmp.ne.s32.totalorder %s17_s10, %s722_s13  ;;  %p728_p2 = scmp.lt.s32.totalorder %s722_s13, %s722_s13 }
   0x7   :  { %p729_p3 = por %p728_p2, %p727_p1 }
   0x9   :  { %p730_p4 = pnand %p729_p3, %p723_p0 }
   0xb   :  { %733 = shalt.err (!%p730_p4)
}
   0xc   :  { %19 = dma.hbm_to_vmem [thread:$0]  %s810_s0, 1152, %s17_s10, [#allocation3]  }
   0xd   :  { %s742_s16 = scalar_lea.vmem %s26_s12, 36864  ;;  %p747_p6 = scmp.lt.s32.totalorder %s26_s12, %s26_s12 }
   0xe   :  { %p743_p5 = scmp.ne.s32.totalorder %s26_s12, %s742_s16  ;;  %p748_p7 = scmp.lt.s32.totalorder %s742_s16, %s742_s16 }
  0x10   :  { %p749_p8 = por %p748_p7, %p747_p6 }
  0x12   :  { %p750_p9 = pnand %p749_p8, %p743_p5 }
  0x14   :  { %753 = shalt.err (!%p750_p9)
}
  0x15   :  { %s782_s17 = smov 256   ;;  %s783_s18 = smov 16  }
  0x16   :  { %31 = dma.hbm_to_vmem [thread:$0]  %s811_s1, 36864, %s26_s12, [#allocation6], %s782_s17, %s782_s17, %s783_s18  }
  0x17   :  { %774 = dma.done.wait [#allocation3], 1152  }
  0x18   :  { %775 = vsyncadd [#allocation3], 4294966144 }
  0x19   :  { %776 = dma.done.wait [#allocation6], 36864  }
  0x1a   :  { %777 = vsyncadd [#allocation6], 4294930432  ;;  %v78_v0 = vld [vmem:[#allocation5 + $0xf8] sm:$0xff]  ;;  %v77_v2 = vld [vmem:[#allocation5 + $0xf0] sm:$0xff]  ;;  %s785_s0 = smov [#allocation7]  }
  0x1b   :  { %v142_v1 = vld [vmem:[#allocation5 + $0x2f8] sm:$0xff]  ;;  %335 = vmatprep.subr.mxu0 %v78_v0  ;;  %v141_v3 = vld [vmem:[#allocation5 + $0x2f0] sm:$0xff]  ;;  %v76_v4 = vld [vmem:[#allocation5 + $0xe8] sm:$0xff]  ;;  %s698_s1 = sshll.u32 %s785_s0, 4  ;;  %s699_s1 = int_to_ptr.vmem [resolvable:$true] %s698_s1 }
  0x1c   :  { %406 = vmatprep.subr.mxu1 %v142_v1  ;;  %v140_v5 = vld [vmem:[#allocation5 + $0x2e8] sm:$0xff]  ;;  %336 = vmatpush1.msra.mxu0 %v77_v2  ;;  %v75_v6 = vld [vmem:[#allocation5 + $0xe0] sm:$0xff]  ;;  %v74_v8 = vld [vmem:[#allocation5 + $0xd8] sm:$0xff]  ;;  %s754_s21 = scalar_lea.vmem %s699_s1, 256  ;;  %p759_p11 = scmp.lt.s32.totalorder %s699_s1, %s699_s1 }
  0x1d   :  { %407 = vmatpush1.msra.mxu1 %v141_v3  ;;  %v139_v7 = vld [vmem:[#allocation5 + $0x2e0] sm:$0xff]  ;;  %337 = vmatprep.subr.mxu0 %v76_v4  ;;  %v138_v9 = vld [vmem:[#allocation5 + $0x2d8] sm:$0xff]  ;;  %v73_v10 = vld [vmem:[#allocation5 + $0xd0] sm:$0xff]  ;;  %p755_p10 = scmp.ne.s32.totalorder %s699_s1, %s754_s21  ;;  %p760_p12 = scmp.lt.s32.totalorder %s754_s21, %s754_s21 }
  0x1e   :  { %408 = vmatprep.subr.mxu1 %v140_v5  ;;  %v137_v11 = vld [vmem:[#allocation5 + $0x2d0] sm:$0xff]  ;;  %338 = vmatpush1.msra.mxu0 %v75_v6  ;;  %v72_v12 = vld [vmem:[#allocation5 + $0xc8] sm:$0xff]  ;;  %v71_v14 = vld [vmem:[#allocation5 + $0xc0] sm:$0xff] }
  0x1f   :  { %409 = vmatpush1.msra.mxu1 %v139_v7  ;;  %v136_v13 = vld [vmem:[#allocation5 + $0x2c8] sm:$0xff]  ;;  %339 = vmatprep.subr.mxu0 %v74_v8  ;;  %v135_v15 = vld [vmem:[#allocation5 + $0x2c0] sm:$0xff]  ;;  %v70_v16 = vld [vmem:[#allocation5 + $0xb8] sm:$0xff]  ;;  %p761_p13 = por %p760_p12, %p759_p11 }
  0x20   :  { %410 = vmatprep.subr.mxu1 %v138_v9  ;;  %340 = vmatpush1.msra.mxu0 %v73_v10  ;;  %v134_v17 = vld [vmem:[#allocation5 + $0x2b8] sm:$0xff]  ;;  %v69_v18 = vld [vmem:[#allocation5 + $0xb0] sm:$0xff]  ;;  %v68_v20 = vld [vmem:[#allocation5 + $0xa8] sm:$0xff] }
  0x21   :  { %411 = vmatpush1.msra.mxu1 %v137_v11  ;;  %341 = vmatprep.subr.mxu0 %v72_v12  ;;  %v133_v19 = vld [vmem:[#allocation5 + $0x2b0] sm:$0xff]  ;;  %v132_v21 = vld [vmem:[#allocation5 + $0x2a8] sm:$0xff]  ;;  %v67_v22 = vld [vmem:[#allocation5 + $0xa0] sm:$0xff]  ;;  %p762_p0 = pnand %p761_p13, %p755_p10 }
  0x22   :  { %412 = vmatprep.subr.mxu1 %v136_v13  ;;  %342 = vmatpush1.msra.mxu0 %v71_v14  ;;  %v131_v23 = vld [vmem:[#allocation5 + $0x2a0] sm:$0xff]  ;;  %v66_v24 = vld [vmem:[#allocation5 + $0x98] sm:$0xff]  ;;  %v65_v26 = vld [vmem:[#allocation5 + $0x90] sm:$0xff] }
  0x23   :  { %413 = vmatpush1.msra.mxu1 %v135_v15  ;;  %343 = vmatprep.subr.mxu0 %v70_v16  ;;  %v130_v25 = vld [vmem:[#allocation5 + $0x298] sm:$0xff]  ;;  %v129_v27 = vld [vmem:[#allocation5 + $0x290] sm:$0xff]  ;;  %v64_v28 = vld [vmem:[#allocation5 + $0x88] sm:$0xff] }
  0x24   :  { %414 = vmatprep.subr.mxu1 %v134_v17  ;;  %344 = vmatpush1.msra.mxu0 %v69_v18  ;;  %v128_v29 = vld [vmem:[#allocation5 + $0x288] sm:$0xff]  ;;  %v63_v30 = vld [vmem:[#allocation5 + $0x80] sm:$0xff]  ;;  %v62_v32 = vld [vmem:[#allocation5 + $0x78] sm:$0xff] }
  0x25   :  { %415 = vmatpush1.msra.mxu1 %v133_v19  ;;  %345 = vmatprep.subr.mxu0 %v68_v20  ;;  %v127_v31 = vld [vmem:[#allocation5 + $0x280] sm:$0xff]  ;;  %v126_v33 = vld [vmem:[#allocation5 + $0x278] sm:$0xff]  ;;  %v61_v34 = vld [vmem:[#allocation5 + $0x70] sm:$0xff] }
  0x26   :  { %416 = vmatprep.subr.mxu1 %v132_v21  ;;  %346 = vmatpush1.msra.mxu0 %v67_v22  ;;  %v125_v35 = vld [vmem:[#allocation5 + $0x270] sm:$0xff]  ;;  %v60_v36 = vld [vmem:[#allocation5 + $0x68] sm:$0xff]  ;;  %v59_v38 = vld [vmem:[#allocation5 + $0x60] sm:$0xff] }
  0x27   :  { %417 = vmatpush1.msra.mxu1 %v131_v23  ;;  %347 = vmatprep.subr.mxu0 %v66_v24  ;;  %v124_v37 = vld [vmem:[#allocation5 + $0x268] sm:$0xff]  ;;  %v123_v39 = vld [vmem:[#allocation5 + $0x260] sm:$0xff]  ;;  %v58_v40 = vld [vmem:[#allocation5 + $0x58] sm:$0xff] }
  0x28   :  { %418 = vmatprep.subr.mxu1 %v130_v25  ;;  %348 = vmatpush1.msra.mxu0 %v65_v26  ;;  %v122_v41 = vld [vmem:[#allocation5 + $0x258] sm:$0xff]  ;;  %v57_v42 = vld [vmem:[#allocation5 + $0x50] sm:$0xff]  ;;  %v56_v44 = vld [vmem:[#allocation5 + $0x48] sm:$0xff] }
  0x29   :  { %419 = vmatpush1.msra.mxu1 %v129_v27  ;;  %349 = vmatprep.subr.mxu0 %v64_v28  ;;  %v121_v43 = vld [vmem:[#allocation5 + $0x250] sm:$0xff]  ;;  %v120_v45 = vld [vmem:[#allocation5 + $0x248] sm:$0xff]  ;;  %v55_v46 = vld [vmem:[#allocation5 + $0x40] sm:$0xff] }
  0x2a   :  { %420 = vmatprep.subr.mxu1 %v128_v29  ;;  %350 = vmatpush1.msra.mxu0 %v63_v30  ;;  %v119_v47 = vld [vmem:[#allocation5 + $0x240] sm:$0xff]  ;;  %v54_v48 = vld [vmem:[#allocation5 + $0x38] sm:$0xff]  ;;  %v53_v50 = vld [vmem:[#allocation5 + $0x30] sm:$0xff] }
  0x2b   :  { %421 = vmatpush1.msra.mxu1 %v127_v31  ;;  %351 = vmatprep.subr.mxu0 %v62_v32  ;;  %v118_v49 = vld [vmem:[#allocation5 + $0x238] sm:$0xff]  ;;  %v117_v51 = vld [vmem:[#allocation5 + $0x230] sm:$0xff]  ;;  %v52_v52 = vld [vmem:[#allocation5 + $0x28] sm:$0xff] }
  0x2c   :  { %422 = vmatprep.subr.mxu1 %v126_v33  ;;  %352 = vmatpush1.msra.mxu0 %v61_v34  ;;  %v116_v53 = vld [vmem:[#allocation5 + $0x228] sm:$0xff]  ;;  %v51_v54 = vld [vmem:[#allocation5 + $0x20] sm:$0xff]  ;;  %v50_v56 = vld [vmem:[#allocation5 + $0x18] sm:$0xff] }
  0x2d   :  { %423 = vmatpush1.msra.mxu1 %v125_v35  ;;  %353 = vmatprep.subr.mxu0 %v60_v36  ;;  %v115_v55 = vld [vmem:[#allocation5 + $0x220] sm:$0xff]  ;;  %v114_v57 = vld [vmem:[#allocation5 + $0x218] sm:$0xff]  ;;  %v49_v58 = vld [vmem:[#allocation5 + $0x10] sm:$0xff] }
  0x2e   :  { %424 = vmatprep.subr.mxu1 %v124_v37  ;;  %354 = vmatpush1.msra.mxu0 %v59_v38  ;;  %v113_v59 = vld [vmem:[#allocation5 + $0x210] sm:$0xff]  ;;  %v48_v60 = vld [vmem:[#allocation5 + $0x8] sm:$0xff]  ;;  %v47_v62 = vld [vmem:[#allocation5] sm:$0xff] }
  0x2f   :  { %425 = vmatpush1.msra.mxu1 %v123_v39  ;;  %355 = vmatprep.subr.mxu0 %v58_v40  ;;  %v112_v61 = vld [vmem:[#allocation5 + $0x208] sm:$0xff]  ;;  %v111_v63 = vld [vmem:[#allocation5 + $0x200] sm:$0xff]  ;;  %v110_v0 = vld [vmem:[#allocation5 + $0x1f8] sm:$0xff] }
  0x30   :  { %426 = vmatprep.subr.mxu1 %v122_v41  ;;  %356 = vmatpush1.msra.mxu0 %v57_v42  ;;  %v174_v1 = vld [vmem:[#allocation5 + $0x3f8] sm:$0xff]  ;;  %v109_v2 = vld [vmem:[#allocation5 + $0x1f0] sm:$0xff]  ;;  %v108_v4 = vld [vmem:[#allocation5 + $0x1e8] sm:$0xff] }
  0x31   :  { %427 = vmatpush1.msra.mxu1 %v121_v43  ;;  %357 = vmatprep.subr.mxu0 %v56_v44  ;;  %v173_v3 = vld [vmem:[#allocation5 + $0x3f0] sm:$0xff]  ;;  %v172_v5 = vld [vmem:[#allocation5 + $0x3e8] sm:$0xff]  ;;  %v107_v6 = vld [vmem:[#allocation5 + $0x1e0] sm:$0xff] }
  0x32   :  { %428 = vmatprep.subr.mxu1 %v120_v45  ;;  %358 = vmatpush1.msra.mxu0 %v55_v46  ;;  %v171_v7 = vld [vmem:[#allocation5 + $0x3e0] sm:$0xff]  ;;  %v106_v8 = vld [vmem:[#allocation5 + $0x1d8] sm:$0xff]  ;;  %v105_v10 = vld [vmem:[#allocation5 + $0x1d0] sm:$0xff] }
  0x33   :  { %429 = vmatpush1.msra.mxu1 %v119_v47  ;;  %359 = vmatprep.subr.mxu0 %v54_v48  ;;  %v170_v9 = vld [vmem:[#allocation5 + $0x3d8] sm:$0xff]  ;;  %v169_v11 = vld [vmem:[#allocation5 + $0x3d0] sm:$0xff]  ;;  %v104_v12 = vld [vmem:[#allocation5 + $0x1c8] sm:$0xff] }
  0x34   :  { %430 = vmatprep.subr.mxu1 %v118_v49  ;;  %360 = vmatpush1.msra.mxu0 %v53_v50  ;;  %v168_v13 = vld [vmem:[#allocation5 + $0x3c8] sm:$0xff]  ;;  %v103_v14 = vld [vmem:[#allocation5 + $0x1c0] sm:$0xff]  ;;  %v102_v16 = vld [vmem:[#allocation5 + $0x1b8] sm:$0xff] }
  0x35   :  { %431 = vmatpush1.msra.mxu1 %v117_v51  ;;  %361 = vmatprep.subr.mxu0 %v52_v52  ;;  %v167_v15 = vld [vmem:[#allocation5 + $0x3c0] sm:$0xff]  ;;  %v166_v17 = vld [vmem:[#allocation5 + $0x3b8] sm:$0xff]  ;;  %v101_v18 = vld [vmem:[#allocation5 + $0x1b0] sm:$0xff] }
  0x36   :  { %432 = vmatprep.subr.mxu1 %v116_v53  ;;  %362 = vmatpush1.msra.mxu0 %v51_v54  ;;  %v165_v19 = vld [vmem:[#allocation5 + $0x3b0] sm:$0xff]  ;;  %v100_v20 = vld [vmem:[#allocation5 + $0x1a8] sm:$0xff]  ;;  %v99_v22 = vld [vmem:[#allocation5 + $0x1a0] sm:$0xff] }
  0x37   :  { %433 = vmatpush1.msra.mxu1 %v115_v55  ;;  %363 = vmatprep.subr.mxu0 %v50_v56  ;;  %v164_v21 = vld [vmem:[#allocation5 + $0x3a8] sm:$0xff]  ;;  %v163_v23 = vld [vmem:[#allocation5 + $0x3a0] sm:$0xff]  ;;  %v98_v24 = vld [vmem:[#allocation5 + $0x198] sm:$0xff] }
  0x38   :  { %434 = vmatprep.subr.mxu1 %v114_v57  ;;  %364 = vmatpush1.msra.mxu0 %v49_v58  ;;  %v162_v25 = vld [vmem:[#allocation5 + $0x398] sm:$0xff]  ;;  %v97_v26 = vld [vmem:[#allocation5 + $0x190] sm:$0xff]  ;;  %v96_v28 = vld [vmem:[#allocation5 + $0x188] sm:$0xff] }
  0x39   :  { %435 = vmatpush1.msra.mxu1 %v113_v59  ;;  %365 = vmatprep.subr.mxu0 %v48_v60  ;;  %v161_v27 = vld [vmem:[#allocation5 + $0x390] sm:$0xff]  ;;  %v160_v29 = vld [vmem:[#allocation5 + $0x388] sm:$0xff]  ;;  %v95_v30 = vld [vmem:[#allocation5 + $0x180] sm:$0xff] }
  0x3a   :  { %436 = vmatprep.subr.mxu1 %v112_v61  ;;  %366 = vmatpush1.msra.mxu0 %v47_v62  ;;  %v159_v31 = vld [vmem:[#allocation5 + $0x380] sm:$0xff]  ;;  %v94_v32 = vld [vmem:[#allocation5 + $0x178] sm:$0xff]  ;;  %v93_v34 = vld [vmem:[#allocation5 + $0x170] sm:$0xff] }
  0x3b   :  { %437 = vmatpush1.msra.mxu1 %v111_v63  ;;  %367 = vmatprep.subr.mxu0 %v110_v0  ;;  %v158_v33 = vld [vmem:[#allocation5 + $0x378] sm:$0xff]  ;;  %v157_v35 = vld [vmem:[#allocation5 + $0x370] sm:$0xff]  ;;  %v92_v36 = vld [vmem:[#allocation5 + $0x168] sm:$0xff] }
  0x3c   :  { %438 = vmatprep.subr.mxu1 %v174_v1  ;;  %368 = vmatpush2.msra.mxu0 %v109_v2  ;;  %v156_v37 = vld [vmem:[#allocation5 + $0x368] sm:$0xff]  ;;  %v91_v38 = vld [vmem:[#allocation5 + $0x160] sm:$0xff]  ;;  %v90_v40 = vld [vmem:[#allocation5 + $0x158] sm:$0xff] }
  0x3d   :  { %439 = vmatpush2.msra.mxu1 %v173_v3  ;;  %369 = vmatprep.subr.mxu0 %v108_v4  ;;  %v155_v39 = vld [vmem:[#allocation5 + $0x360] sm:$0xff]  ;;  %v154_v41 = vld [vmem:[#allocation5 + $0x358] sm:$0xff]  ;;  %v89_v42 = vld [vmem:[#allocation5 + $0x150] sm:$0xff] }
  0x3e   :  { %440 = vmatprep.subr.mxu1 %v172_v5  ;;  %370 = vmatpush2.msra.mxu0 %v107_v6  ;;  %v153_v43 = vld [vmem:[#allocation5 + $0x350] sm:$0xff]  ;;  %v88_v44 = vld [vmem:[#allocation5 + $0x148] sm:$0xff]  ;;  %v87_v46 = vld [vmem:[#allocation5 + $0x140] sm:$0xff] }
  0x3f   :  { %441 = vmatpush2.msra.mxu1 %v171_v7  ;;  %371 = vmatprep.subr.mxu0 %v106_v8  ;;  %v152_v45 = vld [vmem:[#allocation5 + $0x348] sm:$0xff]  ;;  %v151_v47 = vld [vmem:[#allocation5 + $0x340] sm:$0xff]  ;;  %v86_v48 = vld [vmem:[#allocation5 + $0x138] sm:$0xff] }
  0x40   :  { %442 = vmatprep.subr.mxu1 %v170_v9  ;;  %372 = vmatpush2.msra.mxu0 %v105_v10  ;;  %v150_v49 = vld [vmem:[#allocation5 + $0x338] sm:$0xff]  ;;  %v85_v50 = vld [vmem:[#allocation5 + $0x130] sm:$0xff]  ;;  %v84_v52 = vld [vmem:[#allocation5 + $0x128] sm:$0xff] }
  0x41   :  { %443 = vmatpush2.msra.mxu1 %v169_v11  ;;  %373 = vmatprep.subr.mxu0 %v104_v12  ;;  %v149_v51 = vld [vmem:[#allocation5 + $0x330] sm:$0xff]  ;;  %v148_v53 = vld [vmem:[#allocation5 + $0x328] sm:$0xff]  ;;  %v83_v54 = vld [vmem:[#allocation5 + $0x120] sm:$0xff] }
  0x42   :  { %444 = vmatprep.subr.mxu1 %v168_v13  ;;  %374 = vmatpush2.msra.mxu0 %v103_v14  ;;  %v147_v55 = vld [vmem:[#allocation5 + $0x320] sm:$0xff]  ;;  %v82_v56 = vld [vmem:[#allocation5 + $0x118] sm:$0xff]  ;;  %v81_v58 = vld [vmem:[#allocation5 + $0x110] sm:$0xff] }
  0x43   :  { %445 = vmatpush2.msra.mxu1 %v167_v15  ;;  %375 = vmatprep.subr.mxu0 %v102_v16  ;;  %v146_v57 = vld [vmem:[#allocation5 + $0x318] sm:$0xff]  ;;  %v145_v59 = vld [vmem:[#allocation5 + $0x310] sm:$0xff]  ;;  %v80_v60 = vld [vmem:[#allocation5 + $0x108] sm:$0xff] }
  0x44   :  { %446 = vmatprep.subr.mxu1 %v166_v17  ;;  %376 = vmatpush2.msra.mxu0 %v101_v18  ;;  %v144_v61 = vld [vmem:[#allocation5 + $0x308] sm:$0xff]  ;;  %v79_v62 = vld [vmem:[#allocation5 + $0x100] sm:$0xff]  ;;  %v41_v1 = vld [vmem:[#allocation2 + $0x18] sm:$0xff] }
  0x45   :  { %447 = vmatpush2.msra.mxu1 %v165_v19  ;;  %377 = vmatprep.subr.mxu0 %v100_v20  ;;  %v39_v63 = vld [vmem:[#allocation2 + $0x8] sm:$0xff]  ;;  %v38_v2 = vld [vmem:[#allocation2] sm:$0xff]  ;;  %v40_v3 = vld [vmem:[#allocation2 + $0x10] sm:$0xff] }
  0x46   :  { %448 = vmatprep.subr.mxu1 %v164_v21  ;;  %378 = vmatpush2.msra.mxu0 %v99_v22  ;;  %v143_v0 = vld [vmem:[#allocation5 + $0x300] sm:$0xff]  ;;  %v206_v4 = vld [vmem:[#allocation5 + $0x4f8] sm:$0xff]  ;;  %v205_v6 = vld [vmem:[#allocation5 + $0x4f0] sm:$0xff] }
  0x47   :  { %449 = vmatpush2.msra.mxu1 %v163_v23  ;;  %379 = vmatprep.subr.mxu0 %v98_v24  ;;  %v270_v5 = vld [vmem:[#allocation5 + $0x6f8] sm:$0xff]  ;;  %v269_v7 = vld [vmem:[#allocation5 + $0x6f0] sm:$0xff]  ;;  %v204_v8 = vld [vmem:[#allocation5 + $0x4e8] sm:$0xff] }
  0x48   :  { %450 = vmatprep.subr.mxu1 %v162_v25  ;;  %380 = vmatpush2.msra.mxu0 %v97_v26  ;;  %v268_v9 = vld [vmem:[#allocation5 + $0x6e8] sm:$0xff]  ;;  %v203_v10 = vld [vmem:[#allocation5 + $0x4e0] sm:$0xff]  ;;  %v202_v12 = vld [vmem:[#allocation5 + $0x4d8] sm:$0xff] }
  0x49   :  { %451 = vmatpush2.msra.mxu1 %v161_v27  ;;  %381 = vmatprep.subr.mxu0 %v96_v28  ;;  %v267_v11 = vld [vmem:[#allocation5 + $0x6e0] sm:$0xff]  ;;  %v266_v13 = vld [vmem:[#allocation5 + $0x6d8] sm:$0xff]  ;;  %v201_v14 = vld [vmem:[#allocation5 + $0x4d0] sm:$0xff] }
  0x4a   :  { %452 = vmatprep.subr.mxu1 %v160_v29  ;;  %382 = vmatpush2.msra.mxu0 %v95_v30  ;;  %v265_v15 = vld [vmem:[#allocation5 + $0x6d0] sm:$0xff]  ;;  %v200_v16 = vld [vmem:[#allocation5 + $0x4c8] sm:$0xff]  ;;  %v199_v18 = vld [vmem:[#allocation5 + $0x4c0] sm:$0xff] }
  0x4b   :  { %453 = vmatpush2.msra.mxu1 %v159_v31  ;;  %383 = vmatprep.subr.mxu0 %v94_v32  ;;  %v264_v17 = vld [vmem:[#allocation5 + $0x6c8] sm:$0xff]  ;;  %v263_v19 = vld [vmem:[#allocation5 + $0x6c0] sm:$0xff]  ;;  %v198_v20 = vld [vmem:[#allocation5 + $0x4b8] sm:$0xff] }
  0x4c   :  { %454 = vmatprep.subr.mxu1 %v158_v33  ;;  %384 = vmatpush2.msra.mxu0 %v93_v34  ;;  %v262_v21 = vld [vmem:[#allocation5 + $0x6b8] sm:$0xff]  ;;  %v197_v22 = vld [vmem:[#allocation5 + $0x4b0] sm:$0xff]  ;;  %v196_v24 = vld [vmem:[#allocation5 + $0x4a8] sm:$0xff] }
  0x4d   :  { %455 = vmatpush2.msra.mxu1 %v157_v35  ;;  %385 = vmatprep.subr.mxu0 %v92_v36  ;;  %v261_v23 = vld [vmem:[#allocation5 + $0x6b0] sm:$0xff]  ;;  %v260_v25 = vld [vmem:[#allocation5 + $0x6a8] sm:$0xff]  ;;  %v195_v26 = vld [vmem:[#allocation5 + $0x4a0] sm:$0xff] }
  0x4e   :  { %456 = vmatprep.subr.mxu1 %v156_v37  ;;  %386 = vmatpush2.msra.mxu0 %v91_v38  ;;  %v259_v27 = vld [vmem:[#allocation5 + $0x6a0] sm:$0xff]  ;;  %v194_v28 = vld [vmem:[#allocation5 + $0x498] sm:$0xff]  ;;  %v193_v30 = vld [vmem:[#allocation5 + $0x490] sm:$0xff] }
  0x4f   :  { %457 = vmatpush2.msra.mxu1 %v155_v39  ;;  %387 = vmatprep.subr.mxu0 %v90_v40  ;;  %v258_v29 = vld [vmem:[#allocation5 + $0x698] sm:$0xff]  ;;  %v257_v31 = vld [vmem:[#allocation5 + $0x690] sm:$0xff]  ;;  %v192_v32 = vld [vmem:[#allocation5 + $0x488] sm:$0xff] }
  0x50   :  { %458 = vmatprep.subr.mxu1 %v154_v41  ;;  %388 = vmatpush2.msra.mxu0 %v89_v42  ;;  %v256_v33 = vld [vmem:[#allocation5 + $0x688] sm:$0xff]  ;;  %v191_v34 = vld [vmem:[#allocation5 + $0x480] sm:$0xff]  ;;  %v190_v36 = vld [vmem:[#allocation5 + $0x478] sm:$0xff] }
  0x51   :  { %459 = vmatpush2.msra.mxu1 %v153_v43  ;;  %389 = vmatprep.subr.mxu0 %v88_v44  ;;  %v255_v35 = vld [vmem:[#allocation5 + $0x680] sm:$0xff]  ;;  %v254_v37 = vld [vmem:[#allocation5 + $0x678] sm:$0xff]  ;;  %v189_v38 = vld [vmem:[#allocation5 + $0x470] sm:$0xff] }
  0x52   :  { %460 = vmatprep.subr.mxu1 %v152_v45  ;;  %390 = vmatpush2.msra.mxu0 %v87_v46  ;;  %v253_v39 = vld [vmem:[#allocation5 + $0x670] sm:$0xff]  ;;  %v188_v40 = vld [vmem:[#allocation5 + $0x468] sm:$0xff]  ;;  %v187_v42 = vld [vmem:[#allocation5 + $0x460] sm:$0xff] }
  0x53   :  { %461 = vmatpush2.msra.mxu1 %v151_v47  ;;  %391 = vmatprep.subr.mxu0 %v86_v48  ;;  %v252_v41 = vld [vmem:[#allocation5 + $0x668] sm:$0xff]  ;;  %v251_v43 = vld [vmem:[#allocation5 + $0x660] sm:$0xff]  ;;  %v186_v44 = vld [vmem:[#allocation5 + $0x458] sm:$0xff] }
  0x54   :  { %462 = vmatprep.subr.mxu1 %v150_v49  ;;  %392 = vmatpush2.msra.mxu0 %v85_v50  ;;  %v250_v45 = vld [vmem:[#allocation5 + $0x658] sm:$0xff]  ;;  %v185_v46 = vld [vmem:[#allocation5 + $0x450] sm:$0xff]  ;;  %v184_v48 = vld [vmem:[#allocation5 + $0x448] sm:$0xff] }
  0x55   :  { %463 = vmatpush2.msra.mxu1 %v149_v51  ;;  %393 = vmatprep.subr.mxu0 %v84_v52  ;;  %v249_v47 = vld [vmem:[#allocation5 + $0x650] sm:$0xff]  ;;  %v248_v49 = vld [vmem:[#allocation5 + $0x648] sm:$0xff]  ;;  %v183_v50 = vld [vmem:[#allocation5 + $0x440] sm:$0xff] }
  0x56   :  { %464 = vmatprep.subr.mxu1 %v148_v53  ;;  %394 = vmatpush2.msra.mxu0 %v83_v54  ;;  %v247_v51 = vld [vmem:[#allocation5 + $0x640] sm:$0xff]  ;;  %v182_v52 = vld [vmem:[#allocation5 + $0x438] sm:$0xff]  ;;  %v181_v54 = vld [vmem:[#allocation5 + $0x430] sm:$0xff] }
  0x57   :  { %465 = vmatpush2.msra.mxu1 %v147_v55  ;;  %395 = vmatprep.subr.mxu0 %v82_v56  ;;  %v246_v53 = vld [vmem:[#allocation5 + $0x638] sm:$0xff]  ;;  %v245_v55 = vld [vmem:[#allocation5 + $0x630] sm:$0xff]  ;;  %v180_v56 = vld [vmem:[#allocation5 + $0x428] sm:$0xff] }
  0x58   :  { %466 = vmatprep.subr.mxu1 %v146_v57  ;;  %396 = vmatpush2.msra.mxu0 %v81_v58  ;;  %v244_v57 = vld [vmem:[#allocation5 + $0x628] sm:$0xff]  ;;  %v179_v58 = vld [vmem:[#allocation5 + $0x420] sm:$0xff] }
  0x59   :  { %467 = vmatpush2.msra.mxu1 %v145_v59  ;;  %397 = vmatprep.subr.mxu0 %v80_v60  ;;  %v243_v59 = vld [vmem:[#allocation5 + $0x620] sm:$0xff]  ;;  %v178_v60 = vld [vmem:[#allocation5 + $0x418] sm:$0xff] }
  0x5a   :  { %468 = vmatprep.subr.mxu1 %v144_v61  ;;  %398 = vmatpush2.msra.mxu0 %v79_v62  ;;  %v242_v61 = vld [vmem:[#allocation5 + $0x618] sm:$0xff]  ;;  %v177_v62 = vld [vmem:[#allocation5 + $0x410] sm:$0xff] }
  0x5b   :  { %399 = vmatprep.mubr.f32.mxu0 %v39_v63  ;;  %469 = vmatpush2.msra.mxu1 %v143_v0  ;;  %v241_v63 = vld [vmem:[#allocation5 + $0x610] sm:$0xff]  ;;  %v176_v0 = vld [vmem:[#allocation5 + $0x408] sm:$0xff] }
  0x5c   :  { %470 = vmatprep.mubr.f32.mxu1 %v41_v1  ;;  %400 = vmatmul.mubr.f32.vlgmr.msra.gmra.mxu0 %v38_v2  ;;  %v240_v1 = vld [vmem:[#allocation5 + $0x608] sm:$0xff]  ;;  %v175_v2 = vld [vmem:[#allocation5 + $0x400] sm:$0xff] }
  0x5d   :  { %471 = vmatmul.mubr.f32.vlgmr.msra.gmra.mxu1 %v40_v3  ;;  %477 = vmatprep.subr.mxu0 %v206_v4  ;;  %v239_v3 = vld [vmem:[#allocation5 + $0x600] sm:$0xff]  ;;  %v238_v4 = vld [vmem:[#allocation5 + $0x5f8] sm:$0xff] }
  0x5e   :  { %548 = vmatprep.subr.mxu1 %v270_v5  ;;  %478 = vmatpush1.msra.mxu0 %v205_v6  ;;  %v302_v5 = vld [vmem:[#allocation5 + $0x7f8] sm:$0xff]  ;;  %v237_v6 = vld [vmem:[#allocation5 + $0x5f0] sm:$0xff] }
  0x5f   :  { %549 = vmatpush1.msra.mxu1 %v269_v7  ;;  %479 = vmatprep.subr.mxu0 %v204_v8  ;;  %v301_v7 = vld [vmem:[#allocation5 + $0x7f0] sm:$0xff]  ;;  %v236_v8 = vld [vmem:[#allocation5 + $0x5e8] sm:$0xff] }
  0x60   :  { %550 = vmatprep.subr.mxu1 %v268_v9  ;;  %480 = vmatpush1.msra.mxu0 %v203_v10  ;;  %v300_v9 = vld [vmem:[#allocation5 + $0x7e8] sm:$0xff]  ;;  %v235_v10 = vld [vmem:[#allocation5 + $0x5e0] sm:$0xff] }
  0x61   :  { %551 = vmatpush1.msra.mxu1 %v267_v11  ;;  %481 = vmatprep.subr.mxu0 %v202_v12  ;;  %v299_v11 = vld [vmem:[#allocation5 + $0x7e0] sm:$0xff]  ;;  %v234_v12 = vld [vmem:[#allocation5 + $0x5d8] sm:$0xff] }
  0x62   :  { %552 = vmatprep.subr.mxu1 %v266_v13  ;;  %482 = vmatpush1.msra.mxu0 %v201_v14  ;;  %v298_v13 = vld [vmem:[#allocation5 + $0x7d8] sm:$0xff]  ;;  %v233_v14 = vld [vmem:[#allocation5 + $0x5d0] sm:$0xff] }
  0x63   :  { %553 = vmatpush1.msra.mxu1 %v265_v15  ;;  %483 = vmatprep.subr.mxu0 %v200_v16  ;;  %v297_v15 = vld [vmem:[#allocation5 + $0x7d0] sm:$0xff]  ;;  %v232_v16 = vld [vmem:[#allocation5 + $0x5c8] sm:$0xff] }
  0x64   :  { %554 = vmatprep.subr.mxu1 %v264_v17  ;;  %484 = vmatpush1.msra.mxu0 %v199_v18  ;;  %v296_v17 = vld [vmem:[#allocation5 + $0x7c8] sm:$0xff]  ;;  %v231_v18 = vld [vmem:[#allocation5 + $0x5c0] sm:$0xff] }
  0x65   :  { %555 = vmatpush1.msra.mxu1 %v263_v19  ;;  %485 = vmatprep.subr.mxu0 %v198_v20  ;;  %v295_v19 = vld [vmem:[#allocation5 + $0x7c0] sm:$0xff]  ;;  %v230_v20 = vld [vmem:[#allocation5 + $0x5b8] sm:$0xff] }
  0x66   :  { %556 = vmatprep.subr.mxu1 %v262_v21  ;;  %486 = vmatpush1.msra.mxu0 %v197_v22  ;;  %v294_v21 = vld [vmem:[#allocation5 + $0x7b8] sm:$0xff]  ;;  %v229_v22 = vld [vmem:[#allocation5 + $0x5b0] sm:$0xff] }
  0x67   :  { %557 = vmatpush1.msra.mxu1 %v261_v23  ;;  %487 = vmatprep.subr.mxu0 %v196_v24  ;;  %v293_v23 = vld [vmem:[#allocation5 + $0x7b0] sm:$0xff]  ;;  %v228_v24 = vld [vmem:[#allocation5 + $0x5a8] sm:$0xff] }
  0x68   :  { %558 = vmatprep.subr.mxu1 %v260_v25  ;;  %488 = vmatpush1.msra.mxu0 %v195_v26  ;;  %v292_v25 = vld [vmem:[#allocation5 + $0x7a8] sm:$0xff]  ;;  %v227_v26 = vld [vmem:[#allocation5 + $0x5a0] sm:$0xff] }
  0x69   :  { %559 = vmatpush1.msra.mxu1 %v259_v27  ;;  %489 = vmatprep.subr.mxu0 %v194_v28  ;;  %v291_v27 = vld [vmem:[#allocation5 + $0x7a0] sm:$0xff]  ;;  %v226_v28 = vld [vmem:[#allocation5 + $0x598] sm:$0xff] }
  0x6a   :  { %560 = vmatprep.subr.mxu1 %v258_v29  ;;  %490 = vmatpush1.msra.mxu0 %v193_v30  ;;  %v290_v29 = vld [vmem:[#allocation5 + $0x798] sm:$0xff]  ;;  %v225_v30 = vld [vmem:[#allocation5 + $0x590] sm:$0xff] }
  0x6b   :  { %561 = vmatpush1.msra.mxu1 %v257_v31  ;;  %491 = vmatprep.subr.mxu0 %v192_v32  ;;  %v289_v31 = vld [vmem:[#allocation5 + $0x790] sm:$0xff]  ;;  %v224_v32 = vld [vmem:[#allocation5 + $0x588] sm:$0xff] }
  0x6c   :  { %562 = vmatprep.subr.mxu1 %v256_v33  ;;  %492 = vmatpush1.msra.mxu0 %v191_v34  ;;  %v288_v33 = vld [vmem:[#allocation5 + $0x788] sm:$0xff]  ;;  %v223_v34 = vld [vmem:[#allocation5 + $0x580] sm:$0xff] }
  0x6d   :  { %563 = vmatpush1.msra.mxu1 %v255_v35  ;;  %493 = vmatprep.subr.mxu0 %v190_v36  ;;  %v287_v35 = vld [vmem:[#allocation5 + $0x780] sm:$0xff]  ;;  %v222_v36 = vld [vmem:[#allocation5 + $0x578] sm:$0xff] }
  0x6e   :  { %564 = vmatprep.subr.mxu1 %v254_v37  ;;  %494 = vmatpush1.msra.mxu0 %v189_v38  ;;  %v286_v37 = vld [vmem:[#allocation5 + $0x778] sm:$0xff]  ;;  %v221_v38 = vld [vmem:[#allocation5 + $0x570] sm:$0xff] }
  0x6f   :  { %565 = vmatpush1.msra.mxu1 %v253_v39  ;;  %495 = vmatprep.subr.mxu0 %v188_v40  ;;  %v285_v39 = vld [vmem:[#allocation5 + $0x770] sm:$0xff]  ;;  %v220_v40 = vld [vmem:[#allocation5 + $0x568] sm:$0xff] }
  0x70   :  { %566 = vmatprep.subr.mxu1 %v252_v41  ;;  %496 = vmatpush1.msra.mxu0 %v187_v42  ;;  %v284_v41 = vld [vmem:[#allocation5 + $0x768] sm:$0xff]  ;;  %v219_v42 = vld [vmem:[#allocation5 + $0x560] sm:$0xff] }
  0x71   :  { %567 = vmatpush1.msra.mxu1 %v251_v43  ;;  %497 = vmatprep.subr.mxu0 %v186_v44  ;;  %v283_v43 = vld [vmem:[#allocation5 + $0x760] sm:$0xff]  ;;  %v218_v44 = vld [vmem:[#allocation5 + $0x558] sm:$0xff] }
  0x72   :  { %568 = vmatprep.subr.mxu1 %v250_v45  ;;  %498 = vmatpush1.msra.mxu0 %v185_v46  ;;  %v282_v45 = vld [vmem:[#allocation5 + $0x758] sm:$0xff]  ;;  %v217_v46 = vld [vmem:[#allocation5 + $0x550] sm:$0xff] }
  0x73   :  { %569 = vmatpush1.msra.mxu1 %v249_v47  ;;  %499 = vmatprep.subr.mxu0 %v184_v48  ;;  %v281_v47 = vld [vmem:[#allocation5 + $0x750] sm:$0xff]  ;;  %v216_v48 = vld [vmem:[#allocation5 + $0x548] sm:$0xff] }
  0x74   :  { %570 = vmatprep.subr.mxu1 %v248_v49  ;;  %500 = vmatpush1.msra.mxu0 %v183_v50  ;;  %v280_v49 = vld [vmem:[#allocation5 + $0x748] sm:$0xff]  ;;  %v215_v50 = vld [vmem:[#allocation5 + $0x540] sm:$0xff] }
  0x75   :  { %571 = vmatpush1.msra.mxu1 %v247_v51  ;;  %501 = vmatprep.subr.mxu0 %v182_v52  ;;  %v279_v51 = vld [vmem:[#allocation5 + $0x740] sm:$0xff]  ;;  %v214_v52 = vld [vmem:[#allocation5 + $0x538] sm:$0xff] }
  0x76   :  { %572 = vmatprep.subr.mxu1 %v246_v53  ;;  %502 = vmatpush1.msra.mxu0 %v181_v54  ;;  %v278_v53 = vld [vmem:[#allocation5 + $0x738] sm:$0xff]  ;;  %v213_v54 = vld [vmem:[#allocation5 + $0x530] sm:$0xff] }
  0x77   :  { %573 = vmatpush1.msra.mxu1 %v245_v55  ;;  %503 = vmatprep.subr.mxu0 %v180_v56  ;;  %v277_v55 = vld [vmem:[#allocation5 + $0x730] sm:$0xff]  ;;  %v212_v56 = vld [vmem:[#allocation5 + $0x528] sm:$0xff] }
  0x78   :  { %574 = vmatprep.subr.mxu1 %v244_v57  ;;  %504 = vmatpush1.msra.mxu0 %v179_v58  ;;  %v276_v57 = vld [vmem:[#allocation5 + $0x728] sm:$0xff]  ;;  %v211_v58 = vld [vmem:[#allocation5 + $0x520] sm:$0xff] }
  0x79   :  { %575 = vmatpush1.msra.mxu1 %v243_v59  ;;  %505 = vmatprep.subr.mxu0 %v178_v60  ;;  %v275_v59 = vld [vmem:[#allocation5 + $0x720] sm:$0xff]  ;;  %v210_v60 = vld [vmem:[#allocation5 + $0x518] sm:$0xff] }
  0x7a   :  { %576 = vmatprep.subr.mxu1 %v242_v61  ;;  %506 = vmatpush1.msra.mxu0 %v177_v62  ;;  %v274_v61 = vld [vmem:[#allocation5 + $0x718] sm:$0xff]  ;;  %v209_v62 = vld [vmem:[#allocation5 + $0x510] sm:$0xff] }
  0x7b   :  { %577 = vmatpush1.msra.mxu1 %v241_v63  ;;  %507 = vmatprep.subr.mxu0 %v176_v0  ;;  %v43_v63 = vld [vmem:[#allocation2 + $0x28] sm:$0xff]  ;;  %v208_v0 = vld [vmem:[#allocation5 + $0x508] sm:$0xff] }
  0x7c   :  { %578 = vmatprep.subr.mxu1 %v240_v1  ;;  %508 = vmatpush1.msra.mxu0 %v175_v2  ;;  %v273_v1 = vld [vmem:[#allocation5 + $0x710] sm:$0xff]  ;;  %v207_v2 = vld [vmem:[#allocation5 + $0x500] sm:$0xff] }
  0x7d   :  { %579 = vmatpush1.msra.mxu1 %v239_v3  ;;  %509 = vmatprep.subr.mxu0 %v238_v4  ;;  %v272_v3 = vld [vmem:[#allocation5 + $0x708] sm:$0xff]  ;;  %v42_v4 = vld [vmem:[#allocation2 + $0x20] sm:$0xff] }
  0x7e   :  { %580 = vmatprep.subr.mxu1 %v302_v5  ;;  %510 = vmatpush2.msra.mxu0 %v237_v6  ;;  %v334_v5 = vld [vmem:[#allocation5 + $0x8f8] sm:$0xff]  ;;  %v271_v6 = vld [vmem:[#allocation5 + $0x700] sm:$0xff] }
  0x7f   :  { %581 = vmatpush2.msra.mxu1 %v301_v7  ;;  %511 = vmatprep.subr.mxu0 %v236_v8  ;;  %v45_v7 = vld [vmem:[#allocation2 + $0x38] sm:$0xff] }
  0x80   :  { %582 = vmatprep.subr.mxu1 %v300_v9  ;;  %512 = vmatpush2.msra.mxu0 %v235_v10  ;;  %v333_v8 = vld [vmem:[#allocation5 + $0x8f0] sm:$0xff]  ;;  %v44_v9 = vld [vmem:[#allocation2 + $0x30] sm:$0xff] }
  0x81   :  { %583 = vmatpush2.msra.mxu1 %v299_v11  ;;  %513 = vmatprep.subr.mxu0 %v234_v12  ;;  %v332_v10 = vld [vmem:[#allocation5 + $0x8e8] sm:$0xff]  ;;  %v331_v11 = vld [vmem:[#allocation5 + $0x8e0] sm:$0xff]  ;;  %v330_v12 = vld [vmem:[#allocation5 + $0x8d8] sm:$0xff] }
  0x82   :  { %584 = vmatprep.subr.mxu1 %v298_v13  ;;  %514 = vmatpush2.msra.mxu0 %v233_v14  ;;  %v329_v13 = vld [vmem:[#allocation5 + $0x8d0] sm:$0xff]  ;;  %v784_v14 = vmov 0.0  }
  0x83   :  { %585 = vmatpush2.msra.mxu1 %v297_v15  ;;  %515 = vmatprep.subr.mxu0 %v232_v16  ;;  %v328_v15 = vld [vmem:[#allocation5 + $0x8c8] sm:$0xff]  ;;  %v327_v16 = vld [vmem:[#allocation5 + $0x8c0] sm:$0xff] }
  0x84   :  { %586 = vmatprep.subr.mxu1 %v296_v17  ;;  %516 = vmatpush2.msra.mxu0 %v231_v18  ;;  %v326_v17 = vld [vmem:[#allocation5 + $0x8b8] sm:$0xff]  ;;  %v325_v18 = vld [vmem:[#allocation5 + $0x8b0] sm:$0xff] }
  0x85   :  { %587 = vmatpush2.msra.mxu1 %v295_v19  ;;  %517 = vmatprep.subr.mxu0 %v230_v20  ;;  %v324_v19 = vld [vmem:[#allocation5 + $0x8a8] sm:$0xff]  ;;  %v323_v20 = vld [vmem:[#allocation5 + $0x8a0] sm:$0xff] }
  0x86   :  { %588 = vmatprep.subr.mxu1 %v294_v21  ;;  %518 = vmatpush2.msra.mxu0 %v229_v22  ;;  %v322_v21 = vld [vmem:[#allocation5 + $0x898] sm:$0xff]  ;;  %v321_v22 = vld [vmem:[#allocation5 + $0x890] sm:$0xff] }
  0x87   :  { %589 = vmatpush2.msra.mxu1 %v293_v23  ;;  %519 = vmatprep.subr.mxu0 %v228_v24  ;;  %v320_v23 = vld [vmem:[#allocation5 + $0x888] sm:$0xff]  ;;  %v319_v24 = vld [vmem:[#allocation5 + $0x880] sm:$0xff] }
  0x88   :  { %590 = vmatprep.subr.mxu1 %v292_v25  ;;  %520 = vmatpush2.msra.mxu0 %v227_v26  ;;  %v318_v25 = vld [vmem:[#allocation5 + $0x878] sm:$0xff]  ;;  %v317_v26 = vld [vmem:[#allocation5 + $0x870] sm:$0xff] }
  0x89   :  { %591 = vmatpush2.msra.mxu1 %v291_v27  ;;  %521 = vmatprep.subr.mxu0 %v226_v28  ;;  %v316_v27 = vld [vmem:[#allocation5 + $0x868] sm:$0xff]  ;;  %v315_v28 = vld [vmem:[#allocation5 + $0x860] sm:$0xff] }
  0x8a   :  { %592 = vmatprep.subr.mxu1 %v290_v29  ;;  %522 = vmatpush2.msra.mxu0 %v225_v30  ;;  %v314_v29 = vld [vmem:[#allocation5 + $0x858] sm:$0xff]  ;;  %v313_v30 = vld [vmem:[#allocation5 + $0x850] sm:$0xff] }
  0x8b   :  { %593 = vmatpush2.msra.mxu1 %v289_v31  ;;  %523 = vmatprep.subr.mxu0 %v224_v32  ;;  %v312_v31 = vld [vmem:[#allocation5 + $0x848] sm:$0xff]  ;;  %v311_v32 = vld [vmem:[#allocation5 + $0x840] sm:$0xff] }
  0x8c   :  { %594 = vmatprep.subr.mxu1 %v288_v33  ;;  %524 = vmatpush2.msra.mxu0 %v223_v34  ;;  %v310_v33 = vld [vmem:[#allocation5 + $0x838] sm:$0xff]  ;;  %v309_v34 = vld [vmem:[#allocation5 + $0x830] sm:$0xff] }
  0x8d   :  { %595 = vmatpush2.msra.mxu1 %v287_v35  ;;  %525 = vmatprep.subr.mxu0 %v222_v36  ;;  %v308_v35 = vld [vmem:[#allocation5 + $0x828] sm:$0xff]  ;;  %v307_v36 = vld [vmem:[#allocation5 + $0x820] sm:$0xff] }
  0x8e   :  { %596 = vmatprep.subr.mxu1 %v286_v37  ;;  %526 = vmatpush2.msra.mxu0 %v221_v38  ;;  %v306_v37 = vld [vmem:[#allocation5 + $0x818] sm:$0xff]  ;;  %v305_v38 = vld [vmem:[#allocation5 + $0x810] sm:$0xff] }
  0x8f   :  { %597 = vmatpush2.msra.mxu1 %v285_v39  ;;  %527 = vmatprep.subr.mxu0 %v220_v40  ;;  %v304_v39 = vld [vmem:[#allocation5 + $0x808] sm:$0xff]  ;;  %v303_v40 = vld [vmem:[#allocation5 + $0x800] sm:$0xff] }
  0x90   :  { %598 = vmatprep.subr.mxu1 %v284_v41  ;;  %528 = vmatpush2.msra.mxu0 %v219_v42  ;;  %v46_v41 = vld [vmem:[#allocation2 + $0x40] sm:$0xff] }
  0x91   :  { %599 = vmatpush2.msra.mxu1 %v283_v43  ;;  %529 = vmatprep.subr.mxu0 %v218_v44 }
  0x92   :  { %600 = vmatprep.subr.mxu1 %v282_v45  ;;  %530 = vmatpush2.msra.mxu0 %v217_v46 }
  0x93   :  { %601 = vmatpush2.msra.mxu1 %v281_v47  ;;  %531 = vmatprep.subr.mxu0 %v216_v48 }
  0x94   :  { %602 = vmatprep.subr.mxu1 %v280_v49  ;;  %532 = vmatpush2.msra.mxu0 %v215_v50 }
  0x95   :  { %603 = vmatpush2.msra.mxu1 %v279_v51  ;;  %533 = vmatprep.subr.mxu0 %v214_v52 }
  0x96   :  { %604 = vmatprep.subr.mxu1 %v278_v53  ;;  %534 = vmatpush2.msra.mxu0 %v213_v54 }
  0x97   :  { %605 = vmatpush2.msra.mxu1 %v277_v55  ;;  %535 = vmatprep.subr.mxu0 %v212_v56 }
  0x98   :  { %606 = vmatprep.subr.mxu1 %v276_v57  ;;  %536 = vmatpush2.msra.mxu0 %v211_v58 }
  0x99   :  { %607 = vmatpush2.msra.mxu1 %v275_v59  ;;  %537 = vmatprep.subr.mxu0 %v210_v60 }
  0x9a   :  { %608 = vmatprep.subr.mxu1 %v274_v61  ;;  %538 = vmatpush2.msra.mxu0 %v209_v62 }
  0x9b   :  { %541 = vmatprep.mubr.f32.mxu0 %v43_v63  ;;  %539 = vmatprep.subr.mxu0 %v208_v0 }
  0x9c   :  { %609 = vmatpush2.msra.mxu1 %v273_v1  ;;  %540 = vmatpush2.msra.mxu0 %v207_v2 }
  0x9d   :  { %610 = vmatprep.subr.mxu1 %v272_v3  ;;  %542 = vmatmul.mubr.f32.vlgmr.msra.gmra.mxu0 %v42_v4 }
  0x9e   :  { %619 = vmatprep.subr.mxu0 %v334_v5  ;;  %611 = vmatpush2.msra.mxu1 %v271_v6 }
  0x9f   :  { %612 = vmatprep.mubr.f32.mxu1 %v45_v7  ;;  %620 = vmatpush1.msra.mxu0 %v333_v8 }
  0xa0   :  { %613 = vmatmul.mubr.f32.vlgmr.msra.gmra.mxu1 %v44_v9  ;;  %621 = vmatprep.subr.mxu0 %v332_v10 }
  0xa1   :  { %683 = vmatprep.mubr.f32.mxu0 %v784_v14  ;;  %622 = vmatpush1.msra.mxu0 %v331_v11 }
  0xa2   :  { %623 = vmatprep.subr.mxu0 %v330_v12 }
  0xa3   :  { %624 = vmatpush1.msra.mxu0 %v329_v13 }
  0xa4   :  { %625 = vmatprep.subr.mxu0 %v328_v15 }
  0xa5   :  { %626 = vmatpush1.msra.mxu0 %v327_v16 }
  0xa6   :  { %627 = vmatprep.subr.mxu0 %v326_v17 }
  0xa7   :  { %628 = vmatpush1.msra.mxu0 %v325_v18 }
  0xa8   :  { %629 = vmatprep.subr.mxu0 %v324_v19 }
  0xa9   :  { %630 = vmatpush1.msra.mxu0 %v323_v20 }
  0xaa   :  { %631 = vmatprep.subr.mxu0 %v322_v21 }
  0xab   :  { %632 = vmatpush1.msra.mxu0 %v321_v22 }
  0xac   :  { %633 = vmatprep.subr.mxu0 %v320_v23 }
  0xad   :  { %634 = vmatpush1.msra.mxu0 %v319_v24 }
  0xae   :  { %635 = vmatprep.subr.mxu0 %v318_v25 }
  0xaf   :  { %636 = vmatpush1.msra.mxu0 %v317_v26 }
  0xb0   :  { %637 = vmatprep.subr.mxu0 %v316_v27 }
  0xb1   :  { %638 = vmatpush1.msra.mxu0 %v315_v28 }
  0xb2   :  { %639 = vmatprep.subr.mxu0 %v314_v29 }
  0xb3   :  { %640 = vmatpush1.msra.mxu0 %v313_v30 }
  0xb4   :  { %641 = vmatprep.subr.mxu0 %v312_v31 }
  0xb5   :  { %642 = vmatpush1.msra.mxu0 %v311_v32 }
  0xb6   :  { %643 = vmatprep.subr.mxu0 %v310_v33 }
  0xb7   :  { %644 = vmatpush1.msra.mxu0 %v309_v34 }
  0xb8   :  { %645 = vmatprep.subr.mxu0 %v308_v35 }
  0xb9   :  { %646 = vmatpush1.msra.mxu0 %v307_v36 }
  0xba   :  { %647 = vmatprep.subr.mxu0 %v306_v37 }
  0xbb   :  { %648 = vmatpush1.msra.mxu0 %v305_v38 }
  0xbc   :  { %649 = vmatprep.subr.mxu0 %v304_v39 }
  0xbd   :  { %650 = vmatpush1.msra.mxu0 %v303_v40 }
  0xbe   :  { %684 = vmatmul.mubr.f32.vlgmr.msra.gmra.mxu0 %v46_v41 }
 0x11c   :  { %v401_v42 = vpop.f32.mrf.mxu0 }
 0x11d   :  { %v472_v43 = vpop.f32.mrf.mxu1 }
 0x11e   :  { %v403_v44 = vpop.f32.mrf.mxu0  ;;  %v473_v47 = vadd.f32 %v472_v43, %v401_v42 }
 0x11f   :  { %v474_v46 = vpop.f32.mrf.mxu1 }
 0x120   :  { %v475_v50 = vadd.f32 %v474_v46, %v403_v44 }
 0x15d   :  { %v543_v45 = vpop.f32.mrf.mxu0 }
 0x15e   :  { %v544_v51 = vadd.f32 %v543_v45, %v473_v47 }
 0x15f   :  { %v545_v48 = vpop.f32.mrf.mxu0 }
 0x160   :  { %v614_v49 = vpop.f32.mrf.mxu1  ;;  %v546_v52 = vadd.f32 %v545_v48, %v475_v50 }
 0x161   :  { %v615_v54 = vadd.f32 %v614_v49, %v544_v51 }
 0x162   :  { %v616_v53 = vpop.f32.mrf.mxu1 }
 0x163   :  { %v617_v56 = vadd.f32 %v616_v53, %v546_v52 }
 0x17e   :  { %v685_v55 = vpop.f32.mrf.mxu0 }
 0x17f   :  { %v686_v57 = vadd.f32 %v685_v55, %v615_v54 }
 0x180   :  { %v687_v58 = vpop.f32.mrf.mxu0 }
 0x181   :  { %690 = vst [vmem:[#allocation7] sm:$0xff] %v686_v57  ;;  %v688_v59 = vadd.f32 %v687_v58, %v617_v56 }
 0x183   :  { %691 = vst [vmem:[#allocation7 + $0x8] sm:$0xff] %v688_v59 }
 0x184   :  { %765 = shalt.err (!%p762_p0)
}
 0x185   :  { %701 = dma.vmem_to_hbm [thread:$0]  %s699_s1, 256, %s812_s2, [#allocation4]  }
 0x186   :  { %778 = dma.done.wait [#allocation4], 256  }
 0x187   :  { %779 = vsyncadd [#allocation4], 4294967040 }
 0x188   :  { %705 = vsyncpa [#allocation3], 1 }
 0x189   :  { %706 = vsyncpa [#allocation6], 1 }
 0x18a   :  { %707 = vsyncpa [#allocation4], 1 }

</bundles_post_ra>
